<compile_context>
chip_gen: v7x
topology: tpu7x:2x2x1
jax: 0.10.0
libtpu: 0.0.40
codegen_flags: <defaults>
</compile_context>

<pallas_src>
import jax
import jax.numpy as jnp
from jax.experimental import pallas as pl
from jax.experimental.pallas import tpu as pltpu


def _linear_relu_kernel(x_ref, w_ref, b_ref, o_ref):
    # x_ref: (TB, K) f32 VMEM block, native row-major batch tile.
    # w_ref: (1, K)  f32 VMEM, resident across grid steps (constant index_map).
    # b_ref: (1, 1)  f32 SMEM scalar bias.
    # o_ref: (TB, 1) f32 VMEM output tile.
    prod = x_ref[...] * w_ref[...]                 # VPU broadcast multiply
    y = jnp.sum(prod, axis=-1, keepdims=True)      # XLU lane reduce -> (TB, 1)
    y = y + b_ref[0, 0]                            # scalar bias from SMEM
    o_ref[...] = jnp.maximum(y, 0.0).astype(o_ref.dtype)


def mlp_forward(x, w, b, *, block_batch=256):
    """forward(x) = ReLU(x @ w.T + b).

    x: (B, K) f32, w: (N, K) f32 (PyTorch (out, in) layout), b: (N,) f32.
    Returns (B, N) f32.  Kernel assumes N == 1 (as in the reference module).
    """
    B, K = x.shape
    N = w.shape[0]
    assert N == 1, "kernel is specialized for out_features == 1 (layer1)"

    tb = min(block_batch, B)          # batch tile; full-dim or multiple of 8
    grid = (pl.cdiv(B, tb),)
    b2d = b.reshape(1, 1)

    return pl.pallas_call(
        _linear_relu_kernel,
        out_shape=jax.ShapeDtypeStruct((B, N), x.dtype),
        grid=grid,
        in_specs=[
            pl.BlockSpec((tb, K), lambda i: (i, 0)),            # batch tile of x
            pl.BlockSpec((N, K), lambda i: (0, 0)),             # resident weight
            pl.BlockSpec(memory_space=pltpu.MemorySpace.SMEM),  # scalar bias
        ],
        out_specs=pl.BlockSpec((tb, N), lambda i: (i, 0)),
        compiler_params=pltpu.CompilerParams(
            dimension_semantics=("parallel",),
        ),
    )(x, w, b2d)


if __name__ == "__main__":
    key = jax.random.PRNGKey(0)
    kx, kw, kb, kx2 = jax.random.split(key, 4)

    in_features, out_features = 12, 1

    # Deterministic parameter init mimicking torch.nn.Linear's
    # uniform(-1/sqrt(fan_in), 1/sqrt(fan_in)) scheme.
    bound = 1.0 / (in_features ** 0.5)
    w = jax.random.uniform(kw, (out_features, in_features),
                           minval=-bound, maxval=bound, dtype=jnp.float32)
    b = jax.random.uniform(kb, (out_features,),
                           minval=-bound, maxval=bound, dtype=jnp.float32)

    # Small-shape check (matches module usage, B=8).
    batch = 8
    x = jax.random.normal(kx, (batch, in_features), dtype=jnp.float32)
    out = jax.block_until_ready(mlp_forward(x, w, b))
    ref = jnp.maximum(x @ w.T + b, 0.0)
    assert out.shape == (batch, out_features)
    assert jnp.allclose(out, ref, atol=1e-5, rtol=1e-5)

    # Larger check: B >= 128 and not a multiple of 128 / of the batch tile,
    # exercising the multi-step grid and the partial last block.
    batch2 = 300
    x2 = jax.random.normal(kx2, (batch2, in_features), dtype=jnp.float32)
    out2 = jax.block_until_ready(mlp_forward(x2, w, b))
    ref2 = jnp.maximum(x2 @ w.T + b, 0.0)
    assert out2.shape == (batch2, out_features)
    assert jnp.allclose(out2, ref2, atol=1e-5, rtol=1e-5)

    print("KERNEL_OK")
</pallas_src>

<mosaic_0001>
module attributes {stable_mosaic.version = 11 : i64} {
  func.func @_linear_relu_kernel(%arg0: i32, %arg1: memref<8x12xf32, #tpu.memory_space<vmem>>, %arg2: memref<1x12xf32, #tpu.memory_space<vmem>>, %arg3: memref<1x1xf32, #tpu.memory_space<smem>>, %arg4: memref<8x1xf32, #tpu.memory_space<vmem>>) attributes {dimension_semantics = [#tpu.dimension_semantics<parallel>], iteration_bounds = array<i64: 1>, scalar_prefetch = 0 : i64, scratch_operands = 0 : i64, tpu.core_type = #tpu.core_type<tc>, window_params = [{transform_indices = @transform_0, window_bounds = array<i64: 8, 12>}, {pipeline_mode = #tpu.pipeline_mode<synchronous>, transform_indices = @transform_1, window_bounds = array<i64: 1, 12>}, {transform_indices = @transform_2, window_bounds = array<i64: 1, 1>}, {transform_indices = @transform_3, window_bounds = array<i64: 8, 1>}]} {
    %c0 = arith.constant 0 : index
    %c0_0 = arith.constant 0 : index
    %0 = vector.load %arg1[%c0, %c0_0] : memref<8x12xf32, #tpu.memory_space<vmem>>, vector<8x12xf32>
    %c0_1 = arith.constant 0 : index
    %c0_2 = arith.constant 0 : index
    %1 = vector.load %arg2[%c0_1, %c0_2] : memref<1x12xf32, #tpu.memory_space<vmem>>, vector<1x12xf32>
    %2 = vector.broadcast %1 : vector<1x12xf32> to vector<8x12xf32>
    %3 = arith.mulf %0, %2 : vector<8x12xf32>
    %cst = arith.constant dense<0.000000e+00> : vector<8xf32>
    %4 = vector.multi_reduction <add>, %3, %cst [1] : vector<8x12xf32> to vector<8xf32>
    %5 = vector.shape_cast %4 : vector<8xf32> to vector<8x1xf32>
    %c0_3 = arith.constant 0 : index
    %c0_4 = arith.constant 0 : index
    %6 = memref.load %arg3[%c0_3, %c0_4] : memref<1x1xf32, #tpu.memory_space<smem>>
    %7 = vector.broadcast %6 : f32 to vector<8x1xf32>
    %8 = arith.addf %5, %7 : vector<8x1xf32>
    %cst_5 = arith.constant 0.000000e+00 : f32
    %9 = vector.broadcast %cst_5 : f32 to vector<8x1xf32>
    %10 = arith.maximumf %8, %9 : vector<8x1xf32>
    %c0_6 = arith.constant 0 : index
    %c0_7 = arith.constant 0 : index
    %11 = vector.load %arg4[%c0_6, %c0_7] : memref<8x1xf32, #tpu.memory_space<vmem>>, vector<8x1xf32>
    tpu.vector_store %arg4[%c0_6, %c0_7], %10 {strides = array<i32>} : memref<8x1xf32, #tpu.memory_space<vmem>>, vector<8x1xf32>,
    return
  }
  func.func @transform_0(%arg0: i32) -> (i32, i32) {
    %c0_i32 = arith.constant 0 : i32
    %c0_i32_0 = arith.constant 0 : i32
    return %arg0, %c0_i32 : i32, i32
  }
  func.func @transform_1(%arg0: i32) -> (i32, i32) {
    %c0_i32 = arith.constant 0 : i32
    %c0_i32_0 = arith.constant 0 : i32
    %c0_i32_1 = arith.constant 0 : i32
    return %c0_i32, %c0_i32_0 : i32, i32
  }
  func.func @transform_2(%arg0: i32) -> (i32, i32) {
    %c0_i32 = arith.constant 0 : i32
    %c0_i32_0 = arith.constant 0 : i32
    %c0_i32_1 = arith.constant 0 : i32
    return %c0_i32, %c0_i32_0 : i32, i32
  }
  func.func @transform_3(%arg0: i32) -> (i32, i32) {
    %c0_i32 = arith.constant 0 : i32
    %c0_i32_0 = arith.constant 0 : i32
    return %arg0, %c0_i32 : i32, i32
  }
}

</mosaic_0001>

<bundles_post_ra>
// kernel: tpu_custom_call.1
= control target key start
LH: loop header
LB: loop body
LE: loop exit
PB: predicated region body
PF: predicated region fallthrough
CT: control target
= control target key end

     0   :  { %9 = vsyncpa [#allocation4], 0  ;;  %s77_s12 = smov [#allocation3]   ;;  %s119_s0 = inlined_call_operand.hbm [shape: f32[8,12], index: 0, kind: input, shape index: {}]   ;;  %s120_s1 = inlined_call_operand.vmem [shape: f32[1,12], index: 1, kind: input, shape index: {}]   ;;  %s121_s2 = inlined_call_operand.<no memory space> [shape: f32[1,1], index: 2, kind: input, shape index: {}]   ;;  %s122_s3 = inlined_call_operand.vmem [shape: f32[8,1], index: 3, kind: output, shape index: {}]  }
   0x1   :  { %s16_s13 = sshll.u32 %s77_s12, 4  ;;  %s53_s16 = scalar_lea.hbm %s119_s0, 128  ;;  %s17_s13 = int_to_ptr.vmem [resolvable:$true] %s16_s13 }
   0x2   :  { %p54_p0 = scmp.ne.s32.totalorder %s119_s0, %s53_s16  ;;  %p57_p1 = scmp.lt.u32.totalorder %s53_s16, %s119_s0 }
   0x4   :  { %p59_p2 = pnand %p57_p1, %p54_p0 }
   0x6   :  { %62 = shalt.err (!%p59_p2)
}
   0x7   :  { %s63_s21 = scalar_lea.vmem %s17_s13, 128  ;;  %p68_p4 = scmp.lt.s32.totalorder %s17_s13, %s17_s13 }
   0x8   :  { %p64_p3 = scmp.ne.s32.totalorder %s17_s13, %s63_s21  ;;  %p69_p5 = scmp.lt.s32.totalorder %s63_s21, %s63_s21 }
   0xa   :  { %p70_p6 = por %p69_p5, %p68_p4 }
   0xc   :  { %p71_p7 = pnand %p70_p6, %p64_p3 }
   0xe   :  { %74 = shalt.err (!%p71_p7)
}
   0xf   :  { %19 = dma.hbm_to_vmem [thread:$0]  %s119_s0, 128, %s17_s13, [#allocation4]  }
  0x10   :  { %75 = dma.done.wait [#allocation4], 128  }
  0x11   :  { %76 = vsyncadd [#allocation4], 4294967168  ;;  %v27_v0 = vld [vmem:[#allocation3] sm:$0xff]  ;;  %vm36_vm0 = vcmask 97280   ;;  %v41_v4 = vstv %s121_s2  ;;  %vm44_vm1 = vcmask 7168  }
  0x12   :  { %v51_v1 = vld [vmem:[%s120_s1] ss:$0 sm:$0xff] }
  0x13   :  { %v35_v2 = vmul.f32 %v51_v1, %v27_v0 }
  0x15   :  { %v37_v3 = vsel %vm36_vm0, %v35_v2, 0.0 }
  0x16   :  { %38 = vadd.xlane.f32.xlu0 %v37_v3 }
  0xa3   :  { %v39_v5 = vpop.xlane.xlu0 %38 }
  0xa4   :  { %v42_v6 = vadd.f32 %v41_v4, %v39_v5 }
  0xa6   :  { %v43_v7 = vmax.f32 %v42_v6, 0.0 }
  0xa8   :  { %45 = vst.msk [vmem:[%s122_s3] sm:$0xff] %vm44_vm1, %v43_v7 }
  0xa9   :  { %50 = vsyncpa [#allocation4], 1 }

</bundles_post_ra>
